<compile_context>
chip_gen: v7x
topology: tpu7x:2x2x1
jax: 0.10.0
libtpu: 0.0.40
codegen_flags: <defaults>
</compile_context>

<pallas_src>
import math
from functools import partial

import jax
import jax.numpy as jnp
from jax.experimental import pallas as pl
from jax.experimental.pallas import tpu as pltpu


# --------------------------------------------------------------------------
# helpers
# --------------------------------------------------------------------------

def _round_up(x: int, m: int) -> int:
    return ((x + m - 1) // m) * m


_DEFAULT_VMEM_BYTES = 64 << 20  # conservative fallback (v7x per-TensorCore VMEM)


def _vmem_capacity_bytes() -> int:
    """Per-core VMEM capacity: 128 MiB on v5e/v6e, 64 MiB per TC on v7x."""
    try:
        info = pltpu.get_tpu_info()
        cap = int(getattr(info, "vmem_capacity_bytes", 0) or 0)
        if cap > 0:
            return cap
    except Exception:
        pass
    return _DEFAULT_VMEM_BYTES


def _sublane_multiple(dtype) -> int:
    """Minimum second-minor tile multiple for a dtype (8 f32, 16 bf16, 32 int8/fp8)."""
    return {4: 8, 2: 16, 1: 32}.get(jnp.dtype(dtype).itemsize, 8)


def _pick_tile(dim: int, preferred: int, align: int):
    """Pick a tile size for `dim`.  Returns (tile, padded_dim).

    Preference order:
      (a) the full dim when it fits in one tile (no padding; full-dim blocks are
          always layout-legal),
      (b) an aligned divisor of `dim` in [preferred/2, preferred] (no padding),
      (c) `preferred` with zero-padding as a last resort.
    """
    preferred = max(preferred, align)
    if dim <= preferred:
        return dim, dim
    t = (preferred // align) * align
    lo = max(align, preferred // 2)
    while t >= lo:
        if dim % t == 0:
            return t, dim
        t -= align
    t = (preferred // align) * align
    return t, _round_up(dim, t)


def _const_block_spec(shape):
    """BlockSpec for a block whose index_map is constant across the whole grid.

    Single-buffered (pl.Buffered(1)) when supported: the second buffer of a
    constant block is never used, so this halves its VMEM footprint.
    """
    index_map = lambda i: (0, 0)
    try:
        return pl.BlockSpec(shape, index_map, pipeline_mode=pl.Buffered(1))
    except Exception:  # older Pallas without pipeline_mode / Buffered
        return pl.BlockSpec(shape, index_map)


# --------------------------------------------------------------------------
# kernels (weight is fed pre-transposed: wt has shape (K, N))
# --------------------------------------------------------------------------

def _linear_resident_kernel(x_ref, wt_ref, o_ref):
    # x_ref: (tm, K), wt_ref: (K, N) -- resident across the whole grid, o_ref: (tm, N)
    o_ref[...] = jnp.dot(
        x_ref[...], wt_ref[...], preferred_element_type=jnp.float32
    ).astype(o_ref.dtype)


def _linear_tiled_kernel(x_ref, wt_ref, o_ref, acc_ref):
    # grid = (M_tiles, N_tiles, K_tiles); K (last axis) is the reduction axis.
    @pl.when(pl.program_id(2) == 0)
    def _():
        acc_ref[...] = jnp.zeros_like(acc_ref)

    acc_ref[...] += jnp.dot(
        x_ref[...], wt_ref[...], preferred_element_type=jnp.float32
    )

    @pl.when(pl.program_id(2) == pl.num_programs(2) - 1)
    def _():
        o_ref[...] = acc_ref[...].astype(o_ref.dtype)


# --------------------------------------------------------------------------
# wrapper
# --------------------------------------------------------------------------

@partial(jax.jit, static_argnames=("tm", "tn", "tk", "force_tiled"))
def linear_forward(x, w, *, tm=512, tn=512, tk=1024, force_tiled=False):
    """y = einsum('...k, nk -> ...n', x, w) with w: (out_features, in_features)."""
    *lead, K = x.shape
    N, Kw = w.shape
    assert K == Kw, "in_features mismatch"

    M = 1
    for d in lead:
        M *= d
    x2 = x.reshape(M, K)

    out_dtype = x.dtype
    x_bytes = jnp.dtype(x.dtype).itemsize
    w_bytes_el = jnp.dtype(w.dtype).itemsize
    o_bytes = jnp.dtype(out_dtype).itemsize
    w_total_bytes = N * K * w_bytes_el

    sublane = _sublane_multiple(x.dtype)
    vmem_cap = _vmem_capacity_bytes()

    # One-time (K, N) weight transpose: a single N*K HBM pass by XLA, so the kernels
    # always feed the MXU in its native (tm,tk) x (tk,tn) form (no per-step XLU work).
    wt = jnp.transpose(w)  # (K, N)

    # ---------------- weight-resident path ----------------
    # Keep the whole (K, N) weight in VMEM and grid over M only: no K reduction grid,
    # no weight re-reads.  Threshold is generation-aware (~32 MiB on 128 MiB parts,
    # ~16 MiB on v7x's 64 MiB per-TC VMEM); the weight is budgeted conservatively as
    # double-buffered even though the constant BlockSpec requests Buffered(1).
    resident_weight_cap = vmem_cap // 4
    use_resident = (not force_tiled) and (w_total_bytes <= resident_weight_cap)

    if use_resident:
        per_row = 2 * K * x_bytes + 2 * N * o_bytes        # double-buffered x + out rows
        budget = int(0.7 * vmem_cap) - 2 * w_total_bytes
        tm_cap = (budget // per_row) if per_row > 0 else 0
        tm_cap = (tm_cap // sublane) * sublane
        if tm_cap < sublane:
            use_resident = False                           # x/out tiles don't fit -> tiled
        else:
            tm_r_pref = max(sublane, min(tm, tm_cap))
            tm_r, Mp = _pick_tile(M, tm_r_pref, sublane)

    if use_resident:
        x_p = x2 if Mp == M else jnp.pad(x2, ((0, Mp - M), (0, 0)))

        vmem_est = 2 * w_total_bytes + tm_r * (2 * K * x_bytes + 2 * N * o_bytes)
        vmem_lim = min(max(int(1.25 * vmem_est) + (2 << 20), 16 << 20),
                       int(0.9 * vmem_cap))

        cost = pl.CostEstimate(
            flops=2 * M * N * K,
            transcendentals=0,
            bytes_accessed=Mp * K * x_bytes + N * K * w_bytes_el + Mp * N * o_bytes,
        )

        out_p = pl.pallas_call(
            _linear_resident_kernel,
            out_shape=jax.ShapeDtypeStruct((Mp, N), out_dtype),
            grid_spec=pltpu.PrefetchScalarGridSpec(
                num_scalar_prefetch=0,
                grid=(Mp // tm_r,),
                in_specs=[
                    pl.BlockSpec((tm_r, K), lambda i: (i, 0)),
                    _const_block_spec((K, N)),   # DMA'd once, stays resident in VMEM
                ],
                out_specs=pl.BlockSpec((tm_r, N), lambda i: (i, 0)),
            ),
            compiler_params=pltpu.CompilerParams(
                dimension_semantics=("parallel",),
                vmem_limit_bytes=vmem_lim,
            ),
            cost_estimate=cost,
        )(x_p, wt)

        out = out_p if Mp == M else out_p[:M, :]
        return out.reshape(*lead, N)

    # ---------------- general tiled path (large layers) ----------------
    # Large tiles for arithmetic intensity; shrink (rarely) if they would not fit the
    # per-generation VMEM budget.  Tiles prefer divisors of the problem dims so that
    # jnp.pad / output slicing is skipped for the common power-of-two transformer shapes.
    budget = int(0.6 * vmem_cap)
    for tm_p, tn_p, tk_p in ((tm, tn, tk), (256, 256, 512), (128, 128, 256)):
        tm_t, Mp = _pick_tile(M, tm_p, sublane)
        tn_t, Np = _pick_tile(N, tn_p, 128)
        tk_t, Kp = _pick_tile(K, tk_p, 128)
        fp = (2 * tm_t * tk_t * x_bytes          # double-buffered x tile
              + 2 * tk_t * tn_t * w_bytes_el     # double-buffered w tile
              + tm_t * tn_t * 4                  # f32 accumulator
              + 2 * tm_t * tn_t * o_bytes)       # double-buffered out tile
        if fp <= budget:
            break

    # Zero-pad only when needed (K zero-padding preserves the reduction exactly).
    x_p = x2 if (Mp == M and Kp == K) else jnp.pad(x2, ((0, Mp - M), (0, Kp - K)))
    wt_p = wt if (Kp == K and Np == N) else jnp.pad(wt, ((0, Kp - K), (0, Np - N)))

    grid = (Mp // tm_t, Np // tn_t, Kp // tk_t)
    vmem_lim = min(max(int(1.25 * fp) + (2 << 20), 16 << 20), int(0.9 * vmem_cap))

    cost = pl.CostEstimate(
        flops=2 * M * N * K,
        transcendentals=0,
        bytes_accessed=(Mp * Kp * x_bytes * grid[1]        # x re-read per N tile
                        + Kp * Np * w_bytes_el * grid[0]   # w re-read per M tile
                        + Mp * Np * o_bytes),
    )

    out_p = pl.pallas_call(
        _linear_tiled_kernel,
        out_shape=jax.ShapeDtypeStruct((Mp, Np), out_dtype),
        grid_spec=pltpu.PrefetchScalarGridSpec(
            num_scalar_prefetch=0,
            grid=grid,
            in_specs=[
                pl.BlockSpec((tm_t, tk_t), lambda i, j, k: (i, k)),
                pl.BlockSpec((tk_t, tn_t), lambda i, j, k: (k, j)),  # (K, N) layout
            ],
            out_specs=pl.BlockSpec((tm_t, tn_t), lambda i, j, k: (i, j)),
            scratch_shapes=[pltpu.VMEM((tm_t, tn_t), jnp.float32)],
        ),
        compiler_params=pltpu.CompilerParams(
            dimension_semantics=("parallel", "parallel", "arbitrary"),
            vmem_limit_bytes=vmem_lim,
        ),
        cost_estimate=cost,
    )(x_p, wt_p)

    out = out_p if (Mp == M and Np == N) else out_p[:M, :N]
    return out.reshape(*lead, N)


def init_linear_weight(key, in_features, out_features, dtype=jnp.float32):
    # trunc_normal_(mean=0, std=sigma, a=-3*sigma, b=3*sigma)
    sigma = math.sqrt(2.0 / (in_features + out_features))
    std_trunc = jax.random.truncated_normal(
        key, lower=-3.0, upper=3.0, shape=(out_features, in_features), dtype=jnp.float32
    )
    return (std_trunc * sigma).astype(dtype)


if __name__ == "__main__":
    key = jax.random.PRNGKey(0)
    kx, kw, kx2, kw2, kx3, kw3 = jax.random.split(key, 6)

    # --- small f32 case (module-consistent shapes): weight-resident path ---
    batch, seq, in_features, out_features = 2, 8, 32, 64
    x = jax.random.normal(kx, (batch, seq, in_features), dtype=jnp.float32)
    w = init_linear_weight(kw, in_features, out_features, dtype=jnp.float32)
    y = jax.block_until_ready(linear_forward(x, w))
    y_ref = jnp.einsum("...k,nk->...n", x, w, precision=jax.lax.Precision.HIGHEST)
    assert y.shape == (batch, seq, out_features)
    assert jnp.allclose(y, y_ref, atol=1e-4, rtol=1e-4)

    # --- moderate f32 case: forces the tiled reduction-grid path (multi-tile M/N/K) ---
    x2 = jax.random.normal(kx2, (4, 64, 1024), dtype=jnp.float32)   # M=256, K=1024
    w2 = init_linear_weight(kw2, 1024, 512, dtype=jnp.float32)      # N=512
    y2 = jax.block_until_ready(
        linear_forward(x2, w2, tm=128, tn=256, tk=512, force_tiled=True))
    y2_ref = jnp.einsum("...k,nk->...n", x2, w2, precision=jax.lax.Precision.HIGHEST)
    assert y2.shape == (4, 64, 512)
    assert jnp.allclose(y2, y2_ref, atol=2e-2, rtol=2e-2)

    # --- bf16 case (MXU-native feed, f32 accumulation), resident path ---
    x3 = jax.random.normal(kx3, (2, 16, 256), dtype=jnp.float32)
    w3 = init_linear_weight(kw3, 256, 128, dtype=jnp.float32)
    y3 = jax.block_until_ready(
        linear_forward(x3.astype(jnp.bfloat16), w3.astype(jnp.bfloat16)))
    y3_ref = jnp.einsum("...k,nk->...n", x3, w3, precision=jax.lax.Precision.HIGHEST)
    assert y3.shape == (2, 16, 128)
    assert jnp.allclose(y3.astype(jnp.float32), y3_ref, atol=1.5e-1, rtol=5e-2)

    print("KERNEL_OK")
</pallas_src>

<mosaic_0001>
module attributes {stable_mosaic.version = 11 : i64} {
  func.func @_linear_resident_kernel(%arg0: i32, %arg1: memref<16x32xf32, #tpu.memory_space<vmem>>, %arg2: memref<32x64xf32, #tpu.memory_space<vmem>>, %arg3: memref<16x64xf32, #tpu.memory_space<vmem>>) attributes {dimension_semantics = [#tpu.dimension_semantics<parallel>], iteration_bounds = array<i64: 1>, scalar_prefetch = 0 : i64, scratch_operands = 0 : i64, tpu.core_type = #tpu.core_type<tc>, window_params = [{transform_indices = @transform_0, window_bounds = array<i64: 16, 32>}, {pipeline_mode = #tpu.pipeline_mode<synchronous>, transform_indices = @transform_1, window_bounds = array<i64: 32, 64>}, {transform_indices = @transform_2, window_bounds = array<i64: 16, 64>}]} {
    %c0 = arith.constant 0 : index
    %c0_0 = arith.constant 0 : index
    %0 = vector.load %arg1[%c0, %c0_0] : memref<16x32xf32, #tpu.memory_space<vmem>>, vector<16x32xf32>
    %c0_1 = arith.constant 0 : index
    %c0_2 = arith.constant 0 : index
    %1 = vector.load %arg2[%c0_1, %c0_2] : memref<32x64xf32, #tpu.memory_space<vmem>>, vector<32x64xf32>
    %cst = arith.constant dense<0.000000e+00> : vector<16x64xf32>
    %2 = tpu.matmul %0, %1, %cst {dimension_numbers = #tpu.dot_dimension_numbers<[1], [0], [0], [1], [0, 0, 1, 1], [], []>} : vector<16x32xf32>, vector<32x64xf32>, vector<16x64xf32> -> vector<16x64xf32>
    %c0_3 = arith.constant 0 : index
    %c0_4 = arith.constant 0 : index
    %3 = vector.load %arg3[%c0_3, %c0_4] : memref<16x64xf32, #tpu.memory_space<vmem>>, vector<16x64xf32>
    tpu.vector_store %arg3[%c0_3, %c0_4], %2 {strides = array<i32>} : memref<16x64xf32, #tpu.memory_space<vmem>>, vector<16x64xf32>,
    return
  }
  func.func @transform_0(%arg0: i32) -> (i32, i32) {
    %c0_i32 = arith.constant 0 : i32
    %c0_i32_0 = arith.constant 0 : i32
    return %arg0, %c0_i32 : i32, i32
  }
  func.func @transform_1(%arg0: i32) -> (i32, i32) {
    %c0_i32 = arith.constant 0 : i32
    %c0_i32_0 = arith.constant 0 : i32
    %c0_i32_1 = arith.constant 0 : i32
    return %c0_i32, %c0_i32_0 : i32, i32
  }
  func.func @transform_2(%arg0: i32) -> (i32, i32) {
    %c0_i32 = arith.constant 0 : i32
    %c0_i32_0 = arith.constant 0 : i32
    return %arg0, %c0_i32 : i32, i32
  }
}

</mosaic_0001>

<bundles_post_ra>
// kernel: linear_forward.1
= control target key start
LH: loop header
LB: loop body
LE: loop exit
PB: predicated region body
PF: predicated region fallthrough
CT: control target
= control target key end

     0   :  { %7 = vsyncpa [#allocation3], 0  ;;  %s318_s0 = inlined_call_operand.hbm [shape: f32[16,32], index: 0, kind: input, shape index: {}]   ;;  %s319_s1 = inlined_call_operand.hbm [shape: f32[32,64], index: 1, kind: input, shape index: {}]   ;;  %s320_s2 = inlined_call_operand.hbm [shape: f32[16,64], index: 2, kind: output, shape index: {}]  }
   0x1   :  { %8 = vsyncpa [#allocation6], 0 }
   0x2   :  { %9 = vsyncpa [#allocation4], 0  ;;  %s253_s9 = smov [#allocation2]   ;;  %s181_s13 = scalar_lea.hbm %s318_s0, 256 }
   0x3   :  { %s15_s10 = sshll.u32 %s253_s9, 4  ;;  %p182_p0 = scmp.ne.s32.totalorder %s318_s0, %s181_s13  ;;  %s16_s10 = int_to_ptr.vmem [resolvable:$true] %s15_s10 }
   0x4   :  { %p185_p1 = scmp.lt.u32.totalorder %s181_s13, %s318_s0 }
   0x6   :  { %p187_p2 = pnand %p185_p1, %p182_p0 }
   0x8   :  { %190 = shalt.err (!%p187_p2)
}
   0x9   :  { %s191_s18 = scalar_lea.vmem %s16_s10, 256  ;;  %p196_p4 = scmp.lt.s32.totalorder %s16_s10, %s16_s10 }
   0xa   :  { %p192_p3 = scmp.ne.s32.totalorder %s16_s10, %s191_s18  ;;  %p197_p5 = scmp.lt.s32.totalorder %s191_s18, %s191_s18 }
   0xc   :  { %p198_p6 = por %p197_p5, %p196_p4 }
   0xe   :  { %p199_p7 = pnand %p198_p6, %p192_p3 }
  0x10   :  { %202 = shalt.err (!%p199_p7)
}
  0x11   :  { %s254_s19 = smov 128   ;;  %s255_s20 = smov 8  }
  0x12   :  { %21 = dma.hbm_to_vmem [thread:$0]  %s318_s0, 256, %s16_s10, [#allocation3], %s254_s19, %s254_s19, %s255_s20  }
  0x13   :  { %s256_s23 = smov [#allocation5]   ;;  %s203_s27 = scalar_lea.hbm %s319_s1, 512 }
  0x14   :  { %s27_s24 = sshll.u32 %s256_s23, 4  ;;  %p204_p8 = scmp.ne.s32.totalorder %s319_s1, %s203_s27  ;;  %s28_s24 = int_to_ptr.vmem [resolvable:$true] %s27_s24 }
  0x15   :  { %p207_p9 = scmp.lt.u32.totalorder %s203_s27, %s319_s1 }
  0x17   :  { %p209_p10 = pnand %p207_p9, %p204_p8 }
  0x19   :  { %212 = shalt.err (!%p209_p10)
}
  0x1a   :  { %s213_s4 = scalar_lea.vmem %s28_s24, 512  ;;  %p218_p12 = scmp.lt.s32.totalorder %s28_s24, %s28_s24 }
  0x1b   :  { %p214_p11 = scmp.ne.s32.totalorder %s28_s24, %s213_s4  ;;  %p219_p13 = scmp.lt.s32.totalorder %s213_s4, %s213_s4 }
  0x1d   :  { %p220_p0 = por %p219_p13, %p218_p12 }
  0x1f   :  { %p221_p1 = pnand %p220_p0, %p214_p11 }
  0x21   :  { %224 = shalt.err (!%p221_p1)
}
  0x22   :  { %33 = dma.hbm_to_vmem [thread:$0]  %s319_s1, 512, %s28_s24, [#allocation6], %s254_s19, %s254_s19, %s255_s20  }
  0x23   :  { %247 = dma.done.wait [#allocation3], 256  }
  0x24   :  { %248 = vsyncadd [#allocation3], 4294967040 }
  0x25   :  { %249 = dma.done.wait [#allocation6], 512  }
  0x26   :  { %250 = vsyncadd [#allocation6], 4294966784  ;;  %vm46_vm0 = vcmask 261120   ;;  %v42_v0 = vld [vmem:[#allocation5] sm:$0xff]  ;;  %v43_v1 = vld [vmem:[#allocation5 + $0x8] sm:$0xff]  ;;  %s257_s1 = smov [#allocation7]  }
  0x27   :  { %v44_v2 = vld [vmem:[#allocation5 + $0x10] sm:$0xff]  ;;  %v168_v3 = vpack.c.bf16 %v43_v1, %v42_v0  ;;  %v45_v4 = vld [vmem:[#allocation5 + $0x18] sm:$0xff]  ;;  %s136_s6 = sshll.u32 %s257_s1, 4  ;;  %vm128_vm1 = vcmask 523264   ;;  %s137_s6 = int_to_ptr.vmem [resolvable:$true] %s136_s6 }
  0x28   :  { %v40_v5 = vld [vmem:[#allocation2] sm:$0xff]  ;;  %v172_v6 = vpack.c.bf16 %v45_v4, %v44_v2  ;;  %v41_v7 = vld [vmem:[#allocation2 + $0x8] sm:$0xff]  ;;  %s225_s7 = scalar_lea.vmem %s137_s6, 256  ;;  %p230_p3 = scmp.lt.s32.totalorder %s137_s6, %s137_s6 }
  0x29   :  { %165 = vmatprep.mubr.msk.f32.mxu0 %vm46_vm0, %v40_v5  ;;  %169 = vmatprep.subr.bf16.mxu0 %v168_v3  ;;  %p226_p2 = scmp.ne.s32.totalorder %s137_s6, %s225_s7  ;;  %p231_p4 = scmp.lt.s32.totalorder %s225_s7, %s225_s7 }
  0x2a   :  { %171 = vmatpush3.bf16.msra.mxu0 %v168_v3 }
  0x2b   :  { %173 = vmatprep.subr.bf16.mxu0 %v172_v6  ;;  %p232_p5 = por %p231_p4, %p230_p3 }
  0x2d   :  { %p233_p6 = pnand %p232_p5, %p226_p2 }
  0x2e   :  { %175 = vmatpush3.bf16.msra.mxu0 %v172_v6 }
  0x31   :  { %166 = vmatmul.mubr.msk.f32.vlgmr.msra.gmra.mrb[0].mxu0 %vm46_vm0, %v41_v7 }
 0x104   :  { %v167_v8 = vpop.f32.mrb[0].mxu0 }
 0x105   :  { %130 = vst.msk [vmem:[#allocation7 + $0x8] sm:$0xff] %vm128_vm1, %v167_v8  ;;  %v119_v9 = vpop.f32.mrb[1].mxu0 }
 0x106   :  { %129 = vst.msk [vmem:[#allocation7] sm:$0xff] %vm128_vm1, %v119_v9 }
 0x107   :  { %236 = shalt.err (!%p233_p6)
}
 0x108   :  { %s237_s10 = scalar_lea.hbm %s320_s2, 256 }
 0x109   :  { %p238_p7 = scmp.ne.s32.totalorder %s320_s2, %s237_s10  ;;  %p241_p8 = scmp.lt.u32.totalorder %s237_s10, %s320_s2 }
 0x10b   :  { %p243_p9 = pnand %p241_p8, %p238_p7 }
 0x10d   :  { %246 = shalt.err (!%p243_p9)
}
 0x10e   :  { %142 = dma.vmem_to_hbm [thread:$0]  %s137_s6, 256, %s320_s2, [#allocation4], %s254_s19, %s254_s19, %s255_s20  }
 0x10f   :  { %251 = dma.done.wait [#allocation4], 256  }
 0x110   :  { %252 = vsyncadd [#allocation4], 4294967040 }
 0x111   :  { %146 = vsyncpa [#allocation3], 1 }
 0x112   :  { %147 = vsyncpa [#allocation6], 1 }
 0x113   :  { %148 = vsyncpa [#allocation4], 1 }

</bundles_post_ra>
